<compile_context>
chip_gen: v6e
topology: v6e:2x2x1
jax: 0.10.0
libtpu: 0.0.40
codegen_flags: <defaults>
</compile_context>

<pallas_src>
import math
import functools

import jax
import jax.numpy as jnp
from jax import lax
from jax.experimental import pallas as pl
from jax.experimental.pallas import tpu as pltpu


def _cb_focal_kernel(logits_ref, labels_ref, sb_ref, loss_ref, *,
                     gamma, batch, tile_b):
    # Natural layout block: (TB, C).  Cast to f32, then transpose on the XLU
    # so classes sit on sublanes and batch on lanes (lane-dense compute).
    x = logits_ref[...].astype(jnp.float32)          # (TB, C)
    xt = jnp.transpose(x)                            # (C, TB)
    labels = labels_ref[...]                         # (1, TB) int32
    sb_t = sb_ref[...].astype(jnp.float32)           # (1, TB)

    C, TB = xt.shape

    # Numerically stable log-softmax along the class (sublane) axis.
    m = jnp.max(xt, axis=0, keepdims=True)                        # (1, TB)
    shifted = xt - m                                              # (C, TB)
    log_denom = jnp.log(jnp.sum(jnp.exp(shifted), axis=0, keepdims=True))

    # log p_t via a single where-select + sublane reduce (no one-hot floats).
    cls = lax.broadcasted_iota(jnp.int32, (C, TB), 0)             # (C, TB)
    lp_t = jnp.sum(jnp.where(cls == labels, shifted, 0.0),
                   axis=0, keepdims=True) - log_denom             # (1, TB)
    p_t = jnp.exp(lp_t)                                           # (1, TB)

    # Focal term: exact, NaN-free integer power when gamma is integral.
    one_minus = jnp.maximum(1.0 - p_t, 0.0)
    g_int = int(round(gamma))
    if abs(gamma - g_int) < 1e-9 and g_int >= 0:
        focal = lax.integer_pow(one_minus, g_int)
    else:
        # NOTE: for non-integer negative gamma with p_t == 1 torch.pow gives
        # inf; we return 0 for that degenerate lane.
        focal = jnp.where(
            one_minus > 0.0,
            jnp.exp(gamma * jnp.log(jnp.maximum(one_minus, 1e-30))),
            0.0,
        )

    loss = sb_t * focal * (-lp_t)                                 # (1, TB)

    # Mask lanes past the real batch (padded reads of the last partial block).
    col = pl.program_id(0) * tile_b + lax.broadcasted_iota(jnp.int32, (1, TB), 1)
    loss_ref[...] = jnp.where(col < batch, loss, 0.0)


def cb_focal_loss(y_pred, y_true, class_num, beta=0.99, gamma=2.0,
                  reduction="mean", tile_b=None):
    """JAX wrapper mirroring CBFocalLoss(...).forward."""
    y_pred = y_pred.reshape(-1, y_pred.shape[-1])
    B, C = y_pred.shape
    assert len(class_num) == C

    # sub_beta[i] = (1 - beta) / (1 - beta ** class_num[i]), gathered at the
    # true class in the wrapper -> lane-dense (1, B) f32 input.
    sub_beta = jnp.asarray(
        [(1.0 - beta) / (1.0 - math.pow(beta, n)) for n in class_num],
        dtype=jnp.float32,
    )
    y_true_i32 = y_true.reshape(-1).astype(jnp.int32)
    labels = y_true_i32.reshape(1, B)
    sb_t = sub_beta[y_true_i32].reshape(1, B)

    # ---- Generation-aware tile sizing -------------------------------------
    itemsize = jnp.dtype(y_pred.dtype).itemsize
    lane_c = ((C + 127) // 128) * 128      # lane padding of the (TB, C) block
    sub_c = ((C + 7) // 8) * 8             # sublane padding of transposed temps
    try:
        vmem_cap = int(pltpu.get_tpu_info().vmem_capacity_bytes)
    except Exception:                       # fallback: assume the smallest (v7x) VMEM
        vmem_cap = 64 * 1024 * 1024

    # Per-sample VMEM estimate: double-buffered pipeline blocks (logits,
    # labels, sb, out) + in-kernel f32 temporaries (cast + transposed arrays).
    aux_bytes = 3 * 8 * 4                  # labels + sb + out rows, sublane-padded
    per_elem = (2 * (lane_c * itemsize + aux_bytes)
                + lane_c * 4
                + 6 * sub_c * 4)
    budget = (2 * vmem_cap) // 5           # ~40% of physical VMEM as working set
    cap = max(128, (budget // per_elem) // 128 * 128)

    if tile_b is None:
        if B <= 128:
            tile_b = B                      # full-extent block, always legal
        else:
            tile_b = min(cap, ((B + 127) // 128) * 128)
    else:
        assert tile_b == B or tile_b % 128 == 0
    grid = (pl.cdiv(B, tile_b),)

    vmem_limit = min(int(vmem_cap * 3 // 4), 128 * 1024 * 1024)

    kernel = functools.partial(
        _cb_focal_kernel, gamma=float(gamma), batch=B, tile_b=tile_b)

    cost = pl.CostEstimate(
        flops=10 * B * C,
        transcendentals=B * (C + 3),
        bytes_accessed=B * C * itemsize + 3 * B * 4,
    )

    per_sample = pl.pallas_call(
        kernel,
        out_shape=jax.ShapeDtypeStruct((1, B), jnp.float32),
        grid=grid,
        in_specs=[
            pl.BlockSpec((tile_b, C), lambda i: (i, 0)),   # logits, natural [B, C]
            pl.BlockSpec((1, tile_b), lambda i: (0, i)),   # labels, lane-dense
            pl.BlockSpec((1, tile_b), lambda i: (0, i)),   # sub_beta[y_true], lane-dense
        ],
        out_specs=pl.BlockSpec((1, tile_b), lambda i: (0, i)),
        compiler_params=pltpu.CompilerParams(
            dimension_semantics=("parallel",),
            vmem_limit_bytes=vmem_limit,
        ),
        cost_estimate=cost,
    )(y_pred, labels, sb_t)

    if reduction == "none":
        return per_sample                     # (1, B), same shape as the torch module
    elif reduction == "mean":
        return jnp.sum(per_sample) / jnp.float32(B)
    elif reduction == "sum":
        return jnp.sum(per_sample)
    else:
        raise ValueError(
            f"{reduction} is not allow, only permit `none` `mean` and `sum`.")


def _reference(y_pred, y_true, class_num, beta=0.99, gamma=2.0):
    """Pure-JAX reference (reduction='mean')."""
    sub_beta = jnp.asarray(
        [(1.0 - beta) / (1.0 - math.pow(beta, n)) for n in class_num],
        dtype=jnp.float32,
    )
    logp = jax.nn.log_softmax(y_pred, axis=-1)
    p = jnp.exp(logp)
    p_t = jnp.take_along_axis(p, y_true[:, None], axis=1)[:, 0]
    lp_t = jnp.take_along_axis(logp, y_true[:, None], axis=1)[:, 0]
    sb_t = sub_beta[y_true]
    loss = sb_t * (jnp.power(1.0 - p_t, gamma) * (-lp_t))
    return jnp.mean(loss)


if __name__ == "__main__":
    key = jax.random.PRNGKey(0)
    class_num = [50, 120, 30, 400, 75, 10, 200, 60, 90, 15]
    C = len(class_num)

    k1, k2, k3, k4 = jax.random.split(key, 4)

    # Small case: single full-extent block (B <= 128 path).
    B = 8
    y_pred = jax.random.normal(k1, (B, C), dtype=jnp.float32)
    y_true = jax.random.randint(k2, (B,), 0, C, dtype=jnp.int32)
    out = jax.block_until_ready(cb_focal_loss(y_pred, y_true, class_num,
                                              beta=0.99, gamma=2.0))
    ref = _reference(y_pred, y_true, class_num, beta=0.99, gamma=2.0)
    assert jnp.allclose(out, ref, rtol=1e-5, atol=1e-6), (out, ref)

    # Multi-block case with a partial final tile: exercises padded reads,
    # in-kernel lane masking and discarded out-of-range stores.
    B2 = 300
    y_pred2 = jax.random.normal(k3, (B2, C), dtype=jnp.float32)
    y_true2 = jax.random.randint(k4, (B2,), 0, C, dtype=jnp.int32)
    out2 = jax.block_until_ready(cb_focal_loss(y_pred2, y_true2, class_num,
                                               beta=0.99, gamma=2.0, tile_b=128))
    ref2 = _reference(y_pred2, y_true2, class_num, beta=0.99, gamma=2.0)
    assert jnp.allclose(out2, ref2, rtol=1e-5, atol=1e-6), (out2, ref2)

    print("KERNEL_OK")
</pallas_src>

<mosaic_0001>
module attributes {stable_mosaic.version = 11 : i64} {
  func.func @_cb_focal_kernel(%arg0: i32, %arg1: memref<8x10xf32, #tpu.memory_space<vmem>>, %arg2: memref<1x8xi32, #tpu.memory_space<vmem>>, %arg3: memref<1x8xf32, #tpu.memory_space<vmem>>, %arg4: memref<1x8xf32, #tpu.memory_space<vmem>>) attributes {dimension_semantics = [#tpu.dimension_semantics<parallel>], iteration_bounds = array<i64: 1>, scalar_prefetch = 0 : i64, scratch_operands = 0 : i64, tpu.core_type = #tpu.core_type<tc>, window_params = [{transform_indices = @transform_0, window_bounds = array<i64: 8, 10>}, {transform_indices = @transform_1, window_bounds = array<i64: 1, 8>}, {transform_indices = @transform_2, window_bounds = array<i64: 1, 8>}, {transform_indices = @transform_3, window_bounds = array<i64: 1, 8>}]} {
    %c0 = arith.constant 0 : index
    %c0_0 = arith.constant 0 : index
    %0 = vector.load %arg1[%c0, %c0_0] : memref<8x10xf32, #tpu.memory_space<vmem>>, vector<8x10xf32>
    %1 = tpu.transpose %0, [1, 0] : vector<8x10xf32> -> vector<10x8xf32>
    %c0_1 = arith.constant 0 : index
    %c0_2 = arith.constant 0 : index
    %2 = vector.load %arg2[%c0_1, %c0_2] : memref<1x8xi32, #tpu.memory_space<vmem>>, vector<1x8xi32>
    %c0_3 = arith.constant 0 : index
    %c0_4 = arith.constant 0 : index
    %3 = vector.load %arg3[%c0_3, %c0_4] : memref<1x8xf32, #tpu.memory_space<vmem>>, vector<1x8xf32>
    %cst = arith.constant dense<0xFF800000> : vector<8xf32>
    %4 = vector.multi_reduction <maximumf>, %1, %cst [0] : vector<10x8xf32> to vector<8xf32>
    %5 = vector.shape_cast %4 : vector<8xf32> to vector<1x8xf32>
    %6 = vector.broadcast %5 : vector<1x8xf32> to vector<10x8xf32>
    %7 = arith.subf %1, %6 : vector<10x8xf32>
    %8 = math.exp %7 : vector<10x8xf32>
    %cst_5 = arith.constant dense<0.000000e+00> : vector<8xf32>
    %9 = vector.multi_reduction <add>, %8, %cst_5 [0] : vector<10x8xf32> to vector<8xf32>
    %10 = vector.shape_cast %9 : vector<8xf32> to vector<1x8xf32>
    %11 = math.log %10 : vector<1x8xf32>
    %12 = tpu.iota {dimensions = array<i32: 0>} : vector<10x8xi32>
    %13 = vector.broadcast %2 : vector<1x8xi32> to vector<10x8xi32>
    %14 = arith.cmpi eq, %12, %13 : vector<10x8xi32>
    %cst_6 = arith.constant 0.000000e+00 : f32
    %15 = vector.broadcast %cst_6 : f32 to vector<10x8xf32>
    %16 = arith.select %14, %7, %15 : vector<10x8xi1>, vector<10x8xf32>
    %cst_7 = arith.constant dense<0.000000e+00> : vector<8xf32>
    %17 = vector.multi_reduction <add>, %16, %cst_7 [0] : vector<10x8xf32> to vector<8xf32>
    %18 = vector.shape_cast %17 : vector<8xf32> to vector<1x8xf32>
    %19 = arith.subf %18, %11 : vector<1x8xf32>
    %20 = math.exp %19 : vector<1x8xf32>
    %cst_8 = arith.constant 1.000000e+00 : f32
    %21 = vector.broadcast %cst_8 : f32 to vector<1x8xf32>
    %22 = arith.subf %21, %20 : vector<1x8xf32>
    %cst_9 = arith.constant 0.000000e+00 : f32
    %23 = vector.broadcast %cst_9 : f32 to vector<1x8xf32>
    %24 = arith.maximumf %22, %23 : vector<1x8xf32>
    %25 = arith.mulf %24, %24 : vector<1x8xf32>
    %26 = arith.mulf %3, %25 : vector<1x8xf32>
    %cst_10 = arith.constant 0.000000e+00 : f32
    %27 = vector.broadcast %cst_10 : f32 to vector<1x8xf32>
    %28 = arith.subf %27, %19 : vector<1x8xf32>
    %29 = arith.mulf %26, %28 : vector<1x8xf32>
    %c8_i32 = arith.constant 8 : i32
    %30 = arith.muli %arg0, %c8_i32 : i32
    %31 = tpu.iota {dimensions = array<i32: 1>} : vector<1x8xi32>
    %32 = vector.broadcast %30 : i32 to vector<1x8xi32>
    %33 = arith.addi %32, %31 : vector<1x8xi32>
    %c8_i32_11 = arith.constant 8 : i32
    %34 = vector.broadcast %c8_i32_11 : i32 to vector<1x8xi32>
    %35 = arith.cmpi slt, %33, %34 : vector<1x8xi32>
    %cst_12 = arith.constant 0.000000e+00 : f32
    %36 = vector.broadcast %cst_12 : f32 to vector<1x8xf32>
    %37 = arith.select %35, %29, %36 : vector<1x8xi1>, vector<1x8xf32>
    %c0_13 = arith.constant 0 : index
    %c0_14 = arith.constant 0 : index
    %38 = vector.load %arg4[%c0_13, %c0_14] : memref<1x8xf32, #tpu.memory_space<vmem>>, vector<1x8xf32>
    tpu.vector_store %arg4[%c0_13, %c0_14], %37 {strides = array<i32>} : memref<1x8xf32, #tpu.memory_space<vmem>>, vector<1x8xf32>,
    return
  }
  func.func @transform_0(%arg0: i32) -> (i32, i32) {
    %c0_i32 = arith.constant 0 : i32
    %c0_i32_0 = arith.constant 0 : i32
    return %arg0, %c0_i32 : i32, i32
  }
  func.func @transform_1(%arg0: i32) -> (i32, i32) {
    %c0_i32 = arith.constant 0 : i32
    %c0_i32_0 = arith.constant 0 : i32
    return %c0_i32, %arg0 : i32, i32
  }
  func.func @transform_2(%arg0: i32) -> (i32, i32) {
    %c0_i32 = arith.constant 0 : i32
    %c0_i32_0 = arith.constant 0 : i32
    return %c0_i32, %arg0 : i32, i32
  }
  func.func @transform_3(%arg0: i32) -> (i32, i32) {
    %c0_i32 = arith.constant 0 : i32
    %c0_i32_0 = arith.constant 0 : i32
    return %c0_i32, %arg0 : i32, i32
  }
}

</mosaic_0001>

<bundles_post_ra>
// kernel: tpu_custom_call.1
= control target key start
LH: loop header
LB: loop body
LE: loop exit
PB: predicated region body
PF: predicated region fallthrough
CT: control target
= control target key end

     0   :  { %8 = vsyncpa [#allocation3], 0  ;;  %s239_s0 = inlined_call_operand.hbm [shape: f32[8,10], index: 0, kind: input, shape index: {}]   ;;  %s240_s1 = inlined_call_operand.vmem [shape: s32[1,8], index: 1, kind: input, shape index: {}]   ;;  %s241_s2 = inlined_call_operand.vmem [shape: f32[1,8], index: 2, kind: input, shape index: {}]   ;;  %s242_s3 = inlined_call_operand.hbm [shape: f32[1,8], index: 3, kind: output, shape index: {}]  }
   0x1   :  { %9 = vsyncpa [#allocation4], 0  ;;  %s199_s12 = smov [#allocation2]  }
   0x2   :  { %s16_s13 = sshll.u32 %s199_s12, 4  ;;  %s17_s13 = int_to_ptr.vmem [resolvable:$true] %s16_s13 }
   0x3   :  { %s163_s14 = scalar_lea.vmem %s17_s13, 128  ;;  %p168_p1 = scmp.lt.s32.totalorder %s17_s13, %s17_s13 }
   0x4   :  { %p164_p0 = scmp.ne.s32.totalorder %s17_s13, %s163_s14  ;;  %p169_p2 = scmp.lt.s32.totalorder %s163_s14, %s163_s14 }
   0x6   :  { %p170_p3 = por %p169_p2, %p168_p1 }
   0x8   :  { %p171_p4 = pnand %p170_p3, %p164_p0 }
   0xa   :  { %174 = shalt.err (!%p171_p4)
}
   0xb   :  { %19 = dma.hbm_to_vmem [thread:$0]  %s239_s0, 128, %s17_s13, [#allocation3]  }
   0xc   :  { %195 = dma.done.wait [#allocation3], 128  }
   0xd   :  { %196 = vsyncadd [#allocation3], 4294967168  ;;  %v27_v0 = vld [vmem:[#allocation2] sm:$0xff]  ;;  %vm62_vm0 = vcmask 64512   ;;  %vm64_vm1 = vcmask 58368   ;;  %v90_v16 = vlaneseq  ;;  %s200_s19 = smov [#allocation5]  }
   0xe   :  { %28 = vxpose.xlu0.b32.start.end [1/1] (short) (narrow) %v27_v0, 16  ;;  %v143_v19 = vld [vmem:[%s240_s1] ss:$0 sm:$0xff]  ;;  %s134_s20 = sshll.u32 %s200_s19, 4  ;;  %vm126_vm5 = vcmask 57344   ;;  %s135_s20 = int_to_ptr.vmem [resolvable:$true] %s134_s20 }
   0xf   :  { %v91_v17 = vshrl.u32 %v90_v16, 7  ;;  %v61_v49 = vld [vmem:[%s241_s2] sm:$0x1]  ;;  %v121_v50 = vand.u32 127, %v90_v16  ;;  %s175_s21 = scalar_lea.vmem %s135_s20, 16  ;;  %s179_s22 = scalar_lea.vmem %s135_s20, 32 }
  0x10   :  { %p176_p5 = scmp.ne.s32.totalorder %s135_s20, %s175_s21  ;;  %p180_p6 = scmp.lt.s32.totalorder %s135_s20, %s135_s20 }
  0x11   :  { %v92_v18 = vadd.s32 8, %v91_v17  ;;  %vm97_vm2 = vcmp.eq.s32.totalorder %v91_v17, %v143_v19  ;;  %vm124_vm4 = vcmp.lt.s32.totalorder %v121_v50, 8  ;;  %p181_p7 = scmp.lt.s32.totalorder %s179_s22, %s175_s21 }
  0x13   :  { %vm98_vm3 = vcmp.eq.s32.totalorder %v92_v18, %v143_v19  ;;  %p182_p8 = por %p181_p7, %p180_p6 }
  0x15   :  { %p183_p9 = pnand %p182_p8, %p176_p5 }
  0x8a   :  { %v44_v1 = vpop.trf.xlu0 }
  0x8b   :  { %v63_v3 = vsel %vm62_vm0, %v44_v1, -inf }
  0x8e   :  { %v45_v2 = vpop.trf.xlu0 }
  0x8f   :  { %v65_v4 = vsel %vm64_vm1, %v45_v2, -inf }
  0x90   :  { %v66_v5 = vmax.f32 %v63_v3, %v65_v4 }
  0x92   :  { %v67_v6 = vrot.slane %v66_v5, 4 }
  0x94   :  { %v68_v7 = vmax.f32 %v66_v5, %v67_v6 }
  0x96   :  { %v69_v8 = vrot.slane %v68_v7, 2 }
  0x98   :  { %v70_v9 = vmax.f32 %v68_v7, %v69_v8 }
  0x9a   :  { %v71_v10 = vrot.slane %v70_v9, 1 }
  0x9c   :  { %v72_v11 = vmax.f32 %v70_v9, %v71_v10 }
  0x9e   :  { %v73_v12 = vsub.f32 %v44_v1, %v72_v11  ;;  %v74_v13 = vsub.f32 %v45_v2, %v72_v11 }
  0xa0   :  { %v75_v14 = vmul.f32 1.442695, %v73_v12  ;;  %v77_v15 = vmul.f32 1.442695, %v74_v13  ;;  %v99_v23 = vsel %vm97_vm2, %v73_v12, 0.0  ;;  %v100_v24 = vsel %vm98_vm3, %v74_v13, 0.0 }
  0xa1   :  { %v101_v27 = vsel %vm62_vm0, %v99_v23, 0.0  ;;  %v102_v28 = vsel %vm64_vm1, %v100_v24, 0.0 }
  0xa2   :  { %147 = vpow2.f32 %v75_v14  ;;  %v103_v31 = vadd.f32 %v102_v28, %v101_v27 }
  0xa3   :  { %149 = vpow2.f32 %v77_v15 }
  0xa4   :  { %v104_v34 = vrot.slane %v103_v31, 4 }
  0xa6   :  { %v105_v37 = vadd.f32 %v104_v34, %v103_v31 }
  0xa8   :  { %v106_v38 = vrot.slane %v105_v37, 2 }
  0xaa   :  { %v107_v39 = vadd.f32 %v106_v38, %v105_v37 }
  0xac   :  { %v108_v40 = vrot.slane %v107_v39, 1 }
  0xae   :  { %v109_v42 = vadd.f32 %v108_v40, %v107_v39 }
  0xaf   :  { %v148_v20 = vpop.eup %147 }
  0xb0   :  { %v150_v21 = vpop.eup %149  ;;  %v79_v22 = vsel %vm62_vm0, %v148_v20, 0.0 }
  0xb1   :  { %v80_v25 = vsel %vm64_vm1, %v150_v21, 0.0 }
  0xb2   :  { %v81_v26 = vadd.f32 %v80_v25, %v79_v22 }
  0xb4   :  { %v82_v29 = vrot.slane %v81_v26, 4 }
  0xb6   :  { %v83_v30 = vadd.f32 %v82_v29, %v81_v26 }
  0xb8   :  { %v84_v32 = vrot.slane %v83_v30, 2 }
  0xba   :  { %v85_v33 = vadd.f32 %v84_v32, %v83_v30 }
  0xbc   :  { %v86_v35 = vrot.slane %v85_v33, 1 }
  0xbe   :  { %v87_v36 = vadd.f32 %v86_v35, %v85_v33 }
  0xc0   :  { %151 = vlog2.f32 %v87_v36 }
  0xcd   :  { %v152_v41 = vpop.eup %151 }
  0xce   :  { %v89_v43 = vmul.f32 0.6931472, %v152_v41 }
  0xd0   :  { %v110_v44 = vsub.f32 %v109_v42, %v89_v43 }
  0xd2   :  { %v111_v45 = vmul.f32 1.442695, %v110_v44  ;;  %v117_v53 = vsub.f32 0.0, %v110_v44 }
  0xd4   :  { %153 = vpow2.f32 %v111_v45 }
  0xe1   :  { %v154_v46 = vpop.eup %153 }
  0xe2   :  { %v113_v47 = vsub.f32 1.0, %v154_v46 }
  0xe4   :  { %v114_v48 = vmax.f32 %v113_v47, 0.0 }
  0xe6   :  { %v115_v51 = vmul.f32 %v114_v48, %v114_v48 }
  0xe8   :  { %v116_v52 = vmul.f32 %v115_v51, %v61_v49 }
  0xea   :  { %v118_v54 = vmul.f32 %v117_v53, %v116_v52 }
  0xec   :  { %v125_v55 = vsel %vm124_vm4, %v118_v54, 0.0 }
  0xed   :  { %127 = vst.msk [vmem:[#allocation5] sm:$0x1] %vm126_vm5, %v125_v55 }
  0xee   :  { %186 = shalt.err (!%p183_p9)
}
  0xef   :  { %137 = dma.vmem_to_hbm [thread:$0]  %s135_s20, 16, %s242_s3, [#allocation4]  }
  0xf0   :  { %197 = dma.done.wait [#allocation4], 16  }
  0xf1   :  { %198 = vsyncadd [#allocation4], 4294967280 }
  0xf2   :  { %141 = vsyncpa [#allocation3], 1 }
  0xf3   :  { %142 = vsyncpa [#allocation4], 1 }

</bundles_post_ra>
